<compile_context>
chip_gen: v5e
topology: v5e:2x2
jax: 0.10.0
libtpu: 0.0.40
codegen_flags: <defaults>
</compile_context>

<pallas_src>
import math

import jax
import jax.numpy as jnp
from jax.experimental import pallas as pl
from jax.experimental.pallas import tpu as pltpu


_LANE = 128       # vreg lane width (last-dim tiling unit)
_SUBLANE = 8      # vreg sublane count for f32 (second-to-last tiling unit)
_SMALL_WORK_THRESHOLD = 32 * 1024   # MACs below which plain XLA beats a kernel launch


def _round_up(x, m):
    return ((x + m - 1) // m) * m


def _fc_kernel(x_ref, w_ref, b_ref, o_ref):
    # x_ref: [tile_n, in_p]   (row tile of feats)
    # w_ref: [in_p,  out_p]   (weight already transposed + padded; VMEM-resident)
    # b_ref: [1,     out_p]   (bias, VMEM-resident)
    # o_ref: [tile_n, out_p]
    acc = jnp.dot(x_ref[...], w_ref[...], preferred_element_type=jnp.float32)
    o_ref[...] = (acc + b_ref[...]).astype(o_ref.dtype)


def _pick_tile_n(n_rows, in_p, out_p, bytes_per_elem=4, vmem_budget_bytes=24 << 20):
    """Largest row tile (multiple of 8, <=1024) whose double-buffered feats and
    output tiles fit a conservative VMEM budget (safe on v7x's 64 MiB VMEM)."""
    per_row = 2 * (in_p + out_p) * bytes_per_elem  # 2x for double buffering
    tile = vmem_budget_bytes // per_row
    tile = max(_SUBLANE, min(1024, (tile // _SUBLANE) * _SUBLANE))
    tile = min(tile, _round_up(n_rows, _SUBLANE))
    return int(tile)


def fc_layer_forward(feats, weight, bias):
    """Pallas implementation of FCLayer.forward.

    Args:
      feats:  [N, in_size]  float32
      weight: [out_size, in_size] float32   (PyTorch nn.Linear layout)
      bias:   [out_size] float32

    Returns:
      (feats, x) with x = feats @ weight.T + bias, shape [N, out_size]
    """
    n, in_size = feats.shape
    out_size = weight.shape[0]

    # Tiny problems: kernel dispatch + DMA setup dominate -> plain XLA (fusable).
    if n * in_size * max(out_size, 1) < _SMALL_WORK_THRESHOLD:
        return feats, feats @ weight.T + bias

    # Lane-dense padded geometry.
    in_p = _round_up(in_size, _LANE)
    out_p = _round_up(out_size, _LANE)
    tile_n = _pick_tile_n(n, in_p, out_p)
    n_p = _round_up(n, tile_n)

    # Zero-pad operands once in the wrapper (outside the kernel / XLA-fused).
    feats_p = jnp.zeros((n_p, in_p), feats.dtype).at[:n, :in_size].set(feats)
    # Pre-transpose weight once: [out, in] -> [in_p, out_p].
    w_t = jnp.zeros((in_p, out_p), weight.dtype).at[:in_size, :out_size].set(weight.T)
    bias_p = jnp.zeros((1, out_p), bias.dtype).at[0, :out_size].set(bias)

    grid = (n_p // tile_n,)

    x_p = pl.pallas_call(
        _fc_kernel,
        out_shape=jax.ShapeDtypeStruct((n_p, out_p), feats.dtype),
        grid=grid,
        in_specs=[
            # Row tile of feats: streamed + double-buffered over the grid.
            pl.BlockSpec((tile_n, in_p), lambda i: (i, 0)),
            # Weight stays resident (same block every step).
            pl.BlockSpec((in_p, out_p), lambda i: (0, 0)),
            # Bias stays resident.
            pl.BlockSpec((1, out_p), lambda i: (0, 0)),
        ],
        out_specs=pl.BlockSpec((tile_n, out_p), lambda i: (i, 0)),
        compiler_params=pltpu.CompilerParams(
            dimension_semantics=("parallel",),
        ),
    )(feats_p, w_t, bias_p)

    return feats, x_p[:n, :out_size]


def init_fc_params(key, in_size, out_size):
    """Deterministic init mimicking PyTorch nn.Linear defaults (kaiming-uniform)."""
    kw, kb = jax.random.split(key)
    bound_w = math.sqrt(1.0 / in_size) * math.sqrt(3.0)  # kaiming_uniform with a=sqrt(5)
    weight = jax.random.uniform(
        kw, (out_size, in_size), jnp.float32, minval=-bound_w, maxval=bound_w
    )
    bound_b = 1.0 / math.sqrt(in_size)
    bias = jax.random.uniform(
        kb, (out_size,), jnp.float32, minval=-bound_b, maxval=bound_b
    )
    return weight, bias


if __name__ == "__main__":
    key = jax.random.PRNGKey(0)
    k_feats, k_params, k_feats2 = jax.random.split(key, 3)

    # Small-but-realistic dsmil-ish bag: 257 instances (non-multiple of 8 to
    # exercise row padding), 512 features, 1 output score.
    N, IN_SIZE, OUT_SIZE = 257, 512, 1
    feats = jax.random.normal(k_feats, (N, IN_SIZE), dtype=jnp.float32)
    weight, bias = init_fc_params(k_params, IN_SIZE, OUT_SIZE)

    feats_out, x = fc_layer_forward(feats, weight, bias)
    jax.block_until_ready((feats_out, x))

    # Correctness check vs. plain JAX reference (Pallas path).
    x_ref = feats @ weight.T + bias
    assert feats_out.shape == (N, IN_SIZE)
    assert x.shape == (N, OUT_SIZE)
    assert jnp.allclose(x, x_ref, atol=1e-4, rtol=1e-4)

    # Tiny-shape path (falls back to plain XLA; kernel launch would be overhead).
    feats_s = jax.random.normal(k_feats2, (8, 32), dtype=jnp.float32)
    weight_s, bias_s = init_fc_params(k_params, 32, 1)
    feats_s_out, x_s = fc_layer_forward(feats_s, weight_s, bias_s)
    jax.block_until_ready((feats_s_out, x_s))
    assert jnp.allclose(x_s, feats_s @ weight_s.T + bias_s, atol=1e-5, rtol=1e-5)

    print("KERNEL_OK")
</pallas_src>

<mosaic_0001>
module attributes {stable_mosaic.version = 11 : i64} {
  func.func @_fc_kernel(%arg0: i32, %arg1: memref<264x512xf32, #tpu.memory_space<vmem>>, %arg2: memref<512x128xf32, #tpu.memory_space<vmem>>, %arg3: memref<1x128xf32, #tpu.memory_space<vmem>>, %arg4: memref<264x128xf32, #tpu.memory_space<vmem>>) attributes {dimension_semantics = [#tpu.dimension_semantics<parallel>], iteration_bounds = array<i64: 1>, scalar_prefetch = 0 : i64, scratch_operands = 0 : i64, tpu.core_type = #tpu.core_type<tc>, window_params = [{transform_indices = @transform_0, window_bounds = array<i64: 264, 512>}, {pipeline_mode = #tpu.pipeline_mode<synchronous>, transform_indices = @transform_1, window_bounds = array<i64: 512, 128>}, {pipeline_mode = #tpu.pipeline_mode<synchronous>, transform_indices = @transform_2, window_bounds = array<i64: 1, 128>}, {transform_indices = @transform_3, window_bounds = array<i64: 264, 128>}]} {
    %c0 = arith.constant 0 : index
    %c0_0 = arith.constant 0 : index
    %0 = vector.load %arg1[%c0, %c0_0] : memref<264x512xf32, #tpu.memory_space<vmem>>, vector<264x512xf32>
    %c0_1 = arith.constant 0 : index
    %c0_2 = arith.constant 0 : index
    %1 = vector.load %arg2[%c0_1, %c0_2] : memref<512x128xf32, #tpu.memory_space<vmem>>, vector<512x128xf32>
    %cst = arith.constant dense<0.000000e+00> : vector<264x128xf32>
    %2 = tpu.matmul %0, %1, %cst {dimension_numbers = #tpu.dot_dimension_numbers<[1], [0], [0], [1], [0, 0, 1, 1], [], []>} : vector<264x512xf32>, vector<512x128xf32>, vector<264x128xf32> -> vector<264x128xf32>
    %c0_3 = arith.constant 0 : index
    %c0_4 = arith.constant 0 : index
    %3 = vector.load %arg3[%c0_3, %c0_4] : memref<1x128xf32, #tpu.memory_space<vmem>>, vector<1x128xf32>
    %4 = vector.broadcast %3 : vector<1x128xf32> to vector<264x128xf32>
    %5 = arith.addf %2, %4 : vector<264x128xf32>
    %c0_5 = arith.constant 0 : index
    %c0_6 = arith.constant 0 : index
    %6 = vector.load %arg4[%c0_5, %c0_6] : memref<264x128xf32, #tpu.memory_space<vmem>>, vector<264x128xf32>
    tpu.vector_store %arg4[%c0_5, %c0_6], %5 {strides = array<i32>} : memref<264x128xf32, #tpu.memory_space<vmem>>, vector<264x128xf32>,
    return
  }
  func.func @transform_0(%arg0: i32) -> (i32, i32) {
    %c0_i32 = arith.constant 0 : i32
    %c0_i32_0 = arith.constant 0 : i32
    return %arg0, %c0_i32 : i32, i32
  }
  func.func @transform_1(%arg0: i32) -> (i32, i32) {
    %c0_i32 = arith.constant 0 : i32
    %c0_i32_0 = arith.constant 0 : i32
    %c0_i32_1 = arith.constant 0 : i32
    return %c0_i32, %c0_i32_0 : i32, i32
  }
  func.func @transform_2(%arg0: i32) -> (i32, i32) {
    %c0_i32 = arith.constant 0 : i32
    %c0_i32_0 = arith.constant 0 : i32
    %c0_i32_1 = arith.constant 0 : i32
    return %c0_i32, %c0_i32_0 : i32, i32
  }
  func.func @transform_3(%arg0: i32) -> (i32, i32) {
    %c0_i32 = arith.constant 0 : i32
    %c0_i32_0 = arith.constant 0 : i32
    return %arg0, %c0_i32 : i32, i32
  }
}

</mosaic_0001>

<bundles_post_ra>
// kernel: tpu_custom_call.1
= control target key start
LH: loop header
LB: loop body
LE: loop exit
PB: predicated region body
PF: predicated region fallthrough
CT: control target
= control target key end

     0   :  { %8 = vsyncpa [#allocation3], 0  ;;  %s930_s0 = inlined_call_operand.hbm [shape: f32[264,512], index: 0, kind: input, shape index: {}]   ;;  %s931_s1 = inlined_call_operand.hbm [shape: f32[512,128], index: 1, kind: input, shape index: {}]   ;;  %s932_s2 = inlined_call_operand.vmem [shape: f32[1,128], index: 2, kind: input, shape index: {}]   ;;  %s933_s3 = inlined_call_operand.hbm [shape: f32[264,128], index: 3, kind: output, shape index: {}]  }
   0x1   :  { %9 = vsyncpa [#allocation6], 0 }
   0x2   :  { %10 = vsyncpa [#allocation4], 0  ;;  %s15_s14 = sshll.u32 %s930_s0, 4  ;;  %s850_s15 = smov [#allocation2]   ;;  %s16_s14 = int_to_ptr.hbm [resolvable:$true] %s15_s14 }
   0x3   :  { %s17_s16 = sshll.u32 %s850_s15, 4  ;;  %s28_s19 = sshll.u32 %s931_s1, 4  ;;  %s18_s16 = int_to_ptr.vmem [resolvable:$true] %s17_s16  ;;  %s29_s19 = int_to_ptr.hbm [resolvable:$true] %s28_s19 }
   0x4   :  { %s851_s20 = smov 512   ;;  %s852_s21 = smov 32  }
   0x5   :  { %23 = dma.hbm_to_vmem [thread:$0]  %s16_s14, 16896, %s18_s16, [#allocation3], %s851_s20, %s851_s20, %s852_s21  }
   0x6   :  { %s853_s22 = smov [#allocation5]   ;;  %s854_s24 = smov 128  }
   0x7   :  { %s30_s23 = sshll.u32 %s853_s22, 4  ;;  %s855_s25 = smov 8   ;;  %s31_s23 = int_to_ptr.vmem [resolvable:$true] %s30_s23 }
   0x8   :  { %36 = dma.hbm_to_vmem [thread:$0]  %s29_s19, 8192, %s31_s23, [#allocation6], %s854_s24, %s854_s24, %s855_s25  }
   0x9   :  { %844 = dma.done.wait [#allocation3], 16896  }
   0xa   :  { %845 = vsyncadd [#allocation3], 4294950400 }
   0xb   :  { %846 = dma.done.wait [#allocation6], 8192  }
   0xc   :  { %847 = vsyncadd [#allocation6], 4294959104  ;;  %v226_v0 = vld [vmem:[#allocation5 + $0x178] sm:$0xff]  ;;  %v225_v2 = vld [vmem:[#allocation5 + $0x170] sm:$0xff]  ;;  %s750_s29 = sshll.u32 %s933_s3, 4  ;;  %s751_s29 = int_to_ptr.hbm [resolvable:$true] %s750_s29 }
   0xd   :  { %v194_v1 = vld [vmem:[#allocation5 + $0x78] sm:$0xff]  ;;  %479 = vmatpush.msra.mxu2 %v226_v0  ;;  %v193_v4 = vld [vmem:[#allocation5 + $0x70] sm:$0xff]  ;;  %v224_v6 = vld [vmem:[#allocation5 + $0x168] sm:$0xff] }
   0xe   :  { %247 = vmatpush.msra.mxu0 %v194_v1  ;;  %v242_v3 = vld [vmem:[#allocation5 + $0x1f8] sm:$0xff]  ;;  %v241_v7 = vld [vmem:[#allocation5 + $0x1f0] sm:$0xff]  ;;  %v192_v8 = vld [vmem:[#allocation5 + $0x68] sm:$0xff] }
   0xf   :  { %v210_v5 = vld [vmem:[#allocation5 + $0xf8] sm:$0xff]  ;;  %595 = vmatpush.msra.mxu3 %v242_v3  ;;  %480 = vmatpush.msra.mxu2 %v225_v2  ;;  %v209_v9 = vld [vmem:[#allocation5 + $0xf0] sm:$0xff]  ;;  %v240_v10 = vld [vmem:[#allocation5 + $0x1e8] sm:$0xff] }
  0x10   :  { %363 = vmatpush.msra.mxu1 %v210_v5  ;;  %248 = vmatpush.msra.mxu0 %v193_v4  ;;  %v223_v11 = vld [vmem:[#allocation5 + $0x160] sm:$0xff]  ;;  %v208_v13 = vld [vmem:[#allocation5 + $0xe8] sm:$0xff]  ;;  %v222_v16 = vld [vmem:[#allocation5 + $0x158] sm:$0xff] }
  0x11   :  { %596 = vmatpush.msra.mxu3 %v241_v7  ;;  %v191_v12 = vld [vmem:[#allocation5 + $0x60] sm:$0xff]  ;;  %481 = vmatpush.msra.mxu2 %v224_v6  ;;  %v190_v17 = vld [vmem:[#allocation5 + $0x58] sm:$0xff]  ;;  %v221_v20 = vld [vmem:[#allocation5 + $0x150] sm:$0xff] }
  0x12   :  { %364 = vmatpush.msra.mxu1 %v209_v9  ;;  %249 = vmatpush.msra.mxu0 %v192_v8  ;;  %v239_v14 = vld [vmem:[#allocation5 + $0x1e0] sm:$0xff]  ;;  %v238_v18 = vld [vmem:[#allocation5 + $0x1d8] sm:$0xff]  ;;  %v189_v21 = vld [vmem:[#allocation5 + $0x50] sm:$0xff] }
  0x13   :  { %v207_v15 = vld [vmem:[#allocation5 + $0xe0] sm:$0xff]  ;;  %597 = vmatpush.msra.mxu3 %v240_v10  ;;  %482 = vmatpush.msra.mxu2 %v223_v11  ;;  %v206_v19 = vld [vmem:[#allocation5 + $0xd8] sm:$0xff]  ;;  %v237_v22 = vld [vmem:[#allocation5 + $0x1d0] sm:$0xff] }
  0x14   :  { %365 = vmatpush.msra.mxu1 %v208_v13  ;;  %250 = vmatpush.msra.mxu0 %v191_v12  ;;  %v205_v23 = vld [vmem:[#allocation5 + $0xd0] sm:$0xff]  ;;  %v220_v24 = vld [vmem:[#allocation5 + $0x148] sm:$0xff]  ;;  %v219_v28 = vld [vmem:[#allocation5 + $0x140] sm:$0xff] }
  0x15   :  { %598 = vmatpush.msra.mxu3 %v239_v14  ;;  %483 = vmatpush.msra.mxu2 %v222_v16  ;;  %v188_v25 = vld [vmem:[#allocation5 + $0x48] sm:$0xff]  ;;  %v187_v29 = vld [vmem:[#allocation5 + $0x40] sm:$0xff]  ;;  %v218_v32 = vld [vmem:[#allocation5 + $0x138] sm:$0xff] }
  0x16   :  { %366 = vmatpush.msra.mxu1 %v207_v15  ;;  %251 = vmatpush.msra.mxu0 %v190_v17  ;;  %v236_v26 = vld [vmem:[#allocation5 + $0x1c8] sm:$0xff]  ;;  %v235_v30 = vld [vmem:[#allocation5 + $0x1c0] sm:$0xff]  ;;  %v186_v33 = vld [vmem:[#allocation5 + $0x38] sm:$0xff] }
  0x17   :  { %599 = vmatpush.msra.mxu3 %v238_v18  ;;  %484 = vmatpush.msra.mxu2 %v221_v20  ;;  %v204_v27 = vld [vmem:[#allocation5 + $0xc8] sm:$0xff]  ;;  %v203_v31 = vld [vmem:[#allocation5 + $0xc0] sm:$0xff]  ;;  %v234_v34 = vld [vmem:[#allocation5 + $0x1b8] sm:$0xff] }
  0x18   :  { %367 = vmatpush.msra.mxu1 %v206_v19  ;;  %252 = vmatpush.msra.mxu0 %v189_v21  ;;  %v202_v35 = vld [vmem:[#allocation5 + $0xb8] sm:$0xff]  ;;  %v217_v36 = vld [vmem:[#allocation5 + $0x130] sm:$0xff]  ;;  %v216_v40 = vld [vmem:[#allocation5 + $0x128] sm:$0xff] }
  0x19   :  { %600 = vmatpush.msra.mxu3 %v237_v22  ;;  %485 = vmatpush.msra.mxu2 %v220_v24  ;;  %v185_v37 = vld [vmem:[#allocation5 + $0x30] sm:$0xff]  ;;  %v184_v41 = vld [vmem:[#allocation5 + $0x28] sm:$0xff]  ;;  %v215_v44 = vld [vmem:[#allocation5 + $0x120] sm:$0xff] }
  0x1a   :  { %368 = vmatpush.msra.mxu1 %v205_v23  ;;  %253 = vmatpush.msra.mxu0 %v188_v25  ;;  %v233_v38 = vld [vmem:[#allocation5 + $0x1b0] sm:$0xff]  ;;  %v232_v42 = vld [vmem:[#allocation5 + $0x1a8] sm:$0xff]  ;;  %v183_v45 = vld [vmem:[#allocation5 + $0x20] sm:$0xff] }
  0x1b   :  { %601 = vmatpush.msra.mxu3 %v236_v26  ;;  %486 = vmatpush.msra.mxu2 %v219_v28  ;;  %v201_v39 = vld [vmem:[#allocation5 + $0xb0] sm:$0xff]  ;;  %v200_v43 = vld [vmem:[#allocation5 + $0xa8] sm:$0xff]  ;;  %v231_v46 = vld [vmem:[#allocation5 + $0x1a0] sm:$0xff] }
  0x1c   :  { %369 = vmatpush.msra.mxu1 %v204_v27  ;;  %254 = vmatpush.msra.mxu0 %v187_v29  ;;  %v199_v47 = vld [vmem:[#allocation5 + $0xa0] sm:$0xff]  ;;  %v214_v48 = vld [vmem:[#allocation5 + $0x118] sm:$0xff]  ;;  %v213_v52 = vld [vmem:[#allocation5 + $0x110] sm:$0xff] }
  0x1d   :  { %602 = vmatpush.msra.mxu3 %v235_v30  ;;  %487 = vmatpush.msra.mxu2 %v218_v32  ;;  %v182_v49 = vld [vmem:[#allocation5 + $0x18] sm:$0xff]  ;;  %v181_v53 = vld [vmem:[#allocation5 + $0x10] sm:$0xff]  ;;  %v212_v56 = vld [vmem:[#allocation5 + $0x108] sm:$0xff] }
  0x1e   :  { %370 = vmatpush.msra.mxu1 %v203_v31  ;;  %255 = vmatpush.msra.mxu0 %v186_v33  ;;  %v230_v50 = vld [vmem:[#allocation5 + $0x198] sm:$0xff]  ;;  %v229_v54 = vld [vmem:[#allocation5 + $0x190] sm:$0xff]  ;;  %v180_v57 = vld [vmem:[#allocation5 + $0x8] sm:$0xff] }
  0x1f   :  { %603 = vmatpush.msra.mxu3 %v234_v34  ;;  %488 = vmatpush.msra.mxu2 %v217_v36  ;;  %v198_v51 = vld [vmem:[#allocation5 + $0x98] sm:$0xff]  ;;  %v197_v55 = vld [vmem:[#allocation5 + $0x90] sm:$0xff]  ;;  %v228_v58 = vld [vmem:[#allocation5 + $0x188] sm:$0xff] }
  0x20   :  { %371 = vmatpush.msra.mxu1 %v202_v35  ;;  %256 = vmatpush.msra.mxu0 %v185_v37  ;;  %v196_v59 = vld [vmem:[#allocation5 + $0x88] sm:$0xff]  ;;  %v211_v60 = vld [vmem:[#allocation5 + $0x100] sm:$0xff]  ;;  %v49_v62 = vld [vmem:[#allocation2 + $0x10] sm:$0xff] }
  0x21   :  { %604 = vmatpush.msra.mxu3 %v233_v38  ;;  %489 = vmatpush.msra.mxu2 %v216_v40  ;;  %v179_v61 = vld [vmem:[#allocation5] sm:$0xff]  ;;  %v50_v1 = vld [vmem:[#allocation2 + $0x18] sm:$0xff]  ;;  %v48_v3 = vld [vmem:[#allocation2 + $0x8] sm:$0xff] }
  0x22   :  { %372 = vmatpush.msra.mxu1 %v201_v39  ;;  %257 = vmatpush.msra.mxu0 %v184_v41  ;;  %v227_v63 = vld [vmem:[#allocation5 + $0x180] sm:$0xff]  ;;  %v53_v4 = vld [vmem:[#allocation2 + $0x30] sm:$0xff]  ;;  %v54_v6 = vld [vmem:[#allocation2 + $0x38] sm:$0xff] }
  0x23   :  { %605 = vmatpush.msra.mxu3 %v232_v42  ;;  %490 = vmatpush.msra.mxu2 %v215_v44  ;;  %v47_v0 = vld [vmem:[#allocation2] sm:$0xff]  ;;  %v52_v7 = vld [vmem:[#allocation2 + $0x28] sm:$0xff]  ;;  %v57_v8 = vld [vmem:[#allocation2 + $0x50] sm:$0xff] }
  0x24   :  { %373 = vmatpush.msra.mxu1 %v200_v43  ;;  %258 = vmatpush.msra.mxu0 %v183_v45  ;;  %v195_v2 = vld [vmem:[#allocation5 + $0x80] sm:$0xff]  ;;  %v58_v10 = vld [vmem:[#allocation2 + $0x58] sm:$0xff]  ;;  %v56_v11 = vld [vmem:[#allocation2 + $0x48] sm:$0xff] }
  0x25   :  { %606 = vmatpush.msra.mxu3 %v231_v46  ;;  %491 = vmatpush.msra.mxu2 %v214_v48  ;;  %v51_v5 = vld [vmem:[#allocation2 + $0x20] sm:$0xff]  ;;  %v61_v12 = vld [vmem:[#allocation2 + $0x70] sm:$0xff]  ;;  %v62_v14 = vld [vmem:[#allocation2 + $0x78] sm:$0xff] }
  0x26   :  { %374 = vmatpush.msra.mxu1 %v199_v47  ;;  %259 = vmatpush.msra.mxu0 %v182_v49  ;;  %v55_v9 = vld [vmem:[#allocation2 + $0x40] sm:$0xff]  ;;  %v60_v15 = vld [vmem:[#allocation2 + $0x68] sm:$0xff]  ;;  %v65_v16 = vld [vmem:[#allocation2 + $0x90] sm:$0xff] }
  0x27   :  { %607 = vmatpush.msra.mxu3 %v230_v50  ;;  %492 = vmatpush.msra.mxu2 %v213_v52  ;;  %v59_v13 = vld [vmem:[#allocation2 + $0x60] sm:$0xff]  ;;  %v66_v18 = vld [vmem:[#allocation2 + $0x98] sm:$0xff]  ;;  %v64_v19 = vld [vmem:[#allocation2 + $0x88] sm:$0xff] }
  0x28   :  { %375 = vmatpush.msra.mxu1 %v198_v51  ;;  %260 = vmatpush.msra.mxu0 %v181_v53  ;;  %v63_v17 = vld [vmem:[#allocation2 + $0x80] sm:$0xff]  ;;  %v69_v20 = vld [vmem:[#allocation2 + $0xb0] sm:$0xff]  ;;  %v70_v22 = vld [vmem:[#allocation2 + $0xb8] sm:$0xff] }
  0x29   :  { %608 = vmatpush.msra.mxu3 %v229_v54  ;;  %493 = vmatpush.msra.mxu2 %v212_v56  ;;  %v67_v21 = vld [vmem:[#allocation2 + $0xa0] sm:$0xff]  ;;  %v68_v23 = vld [vmem:[#allocation2 + $0xa8] sm:$0xff]  ;;  %v73_v24 = vld [vmem:[#allocation2 + $0xd0] sm:$0xff] }
  0x2a   :  { %376 = vmatpush.msra.mxu1 %v197_v55  ;;  %261 = vmatpush.msra.mxu0 %v180_v57  ;;  %v71_v25 = vld [vmem:[#allocation2 + $0xc0] sm:$0xff]  ;;  %v74_v26 = vld [vmem:[#allocation2 + $0xd8] sm:$0xff]  ;;  %v72_v27 = vld [vmem:[#allocation2 + $0xc8] sm:$0xff] }
  0x2b   :  { %609 = vmatpush.msra.mxu3 %v228_v58  ;;  %494 = vmatpush.msra.mxu2 %v211_v60  ;;  %v77_v28 = vld [vmem:[#allocation2 + $0xf0] sm:$0xff]  ;;  %v75_v29 = vld [vmem:[#allocation2 + $0xe0] sm:$0xff]  ;;  %v78_v30 = vld [vmem:[#allocation2 + $0xf8] sm:$0xff] }
  0x2c   :  { %377 = vmatpush.msra.mxu1 %v196_v59  ;;  %262 = vmatpush.msra.mxu0 %v179_v61  ;;  %v76_v31 = vld [vmem:[#allocation2 + $0xe8] sm:$0xff]  ;;  %v81_v32 = vld [vmem:[#allocation2 + $0x110] sm:$0xff]  ;;  %v79_v33 = vld [vmem:[#allocation2 + $0x100] sm:$0xff] }
  0x2d   :  { %495 = vmatmul.f32.vlgmr.msra.gmra.mxu2 %v49_v62  ;;  %610 = vmatpush.msra.mxu3 %v227_v63  ;;  %v82_v34 = vld [vmem:[#allocation2 + $0x118] sm:$0xff]  ;;  %v80_v35 = vld [vmem:[#allocation2 + $0x108] sm:$0xff]  ;;  %v85_v36 = vld [vmem:[#allocation2 + $0x130] sm:$0xff] }
  0x2e   :  { %263 = vmatmul.f32.vlgmr.msra.gmra.mxu0 %v47_v0  ;;  %611 = vmatmul.f32.vlgmr.msra.gmra.mxu3 %v50_v1  ;;  %v83_v37 = vld [vmem:[#allocation2 + $0x120] sm:$0xff]  ;;  %v86_v38 = vld [vmem:[#allocation2 + $0x138] sm:$0xff]  ;;  %v84_v39 = vld [vmem:[#allocation2 + $0x128] sm:$0xff] }
  0x2f   :  { %378 = vmatpush.msra.mxu1 %v195_v2  ;;  %v89_v40 = vld [vmem:[#allocation2 + $0x150] sm:$0xff]  ;;  %v87_v41 = vld [vmem:[#allocation2 + $0x140] sm:$0xff]  ;;  %v90_v42 = vld [vmem:[#allocation2 + $0x158] sm:$0xff] }
  0x30   :  { %379 = vmatmul.f32.vlgmr.msra.gmra.mxu1 %v48_v3  ;;  %v88_v43 = vld [vmem:[#allocation2 + $0x148] sm:$0xff]  ;;  %v93_v44 = vld [vmem:[#allocation2 + $0x170] sm:$0xff]  ;;  %v91_v45 = vld [vmem:[#allocation2 + $0x160] sm:$0xff] }
  0x31   :  { %v94_v46 = vld [vmem:[#allocation2 + $0x178] sm:$0xff]  ;;  %v92_v47 = vld [vmem:[#allocation2 + $0x168] sm:$0xff]  ;;  %v97_v48 = vld [vmem:[#allocation2 + $0x190] sm:$0xff] }
  0x32   :  { %v95_v49 = vld [vmem:[#allocation2 + $0x180] sm:$0xff]  ;;  %v98_v50 = vld [vmem:[#allocation2 + $0x198] sm:$0xff]  ;;  %v96_v51 = vld [vmem:[#allocation2 + $0x188] sm:$0xff] }
  0x33   :  { %v101_v52 = vld [vmem:[#allocation2 + $0x1b0] sm:$0xff]  ;;  %v99_v53 = vld [vmem:[#allocation2 + $0x1a0] sm:$0xff]  ;;  %v102_v54 = vld [vmem:[#allocation2 + $0x1b8] sm:$0xff] }
  0x34   :  { %v100_v55 = vld [vmem:[#allocation2 + $0x1a8] sm:$0xff]  ;;  %v105_v56 = vld [vmem:[#allocation2 + $0x1d0] sm:$0xff]  ;;  %v103_v57 = vld [vmem:[#allocation2 + $0x1c0] sm:$0xff] }
  0x35   :  { %498 = vmatmul.f32.gmra.mxu2 %v53_v4  ;;  %v106_v58 = vld [vmem:[#allocation2 + $0x1d8] sm:$0xff]  ;;  %v104_v59 = vld [vmem:[#allocation2 + $0x1c8] sm:$0xff]  ;;  %v109_v60 = vld [vmem:[#allocation2 + $0x1f0] sm:$0xff] }
  0x36   :  { %266 = vmatmul.f32.gmra.mxu0 %v51_v5  ;;  %614 = vmatmul.f32.gmra.mxu3 %v54_v6  ;;  %v107_v61 = vld [vmem:[#allocation2 + $0x1e0] sm:$0xff]  ;;  %v110_v62 = vld [vmem:[#allocation2 + $0x1f8] sm:$0xff]  ;;  %v108_v63 = vld [vmem:[#allocation2 + $0x1e8] sm:$0xff] }
  0x37   :  { %v889_v0 = vld [vmem:[%s932_s2] ss:$0 sm:$0xff]  ;;  %v113_v1 = vld [vmem:[#allocation2 + $0x210] sm:$0xff]  ;;  %v114_v4 = vld [vmem:[#allocation2 + $0x218] sm:$0xff]  ;;  %s856_s2 = smov [#allocation7]  }
  0x38   :  { %382 = vmatmul.f32.gmra.mxu1 %v52_v7  ;;  %v111_v3 = vld [vmem:[#allocation2 + $0x200] sm:$0xff]  ;;  %v112_v7 = vld [vmem:[#allocation2 + $0x208] sm:$0xff]  ;;  %s748_s26 = sshll.u32 %s856_s2, 4  ;;  %s749_s26 = int_to_ptr.vmem [resolvable:$true] %s748_s26 }
  0x3d   :  { %501 = vmatmul.f32.gmra.mxu2 %v57_v8 }
  0x3e   :  { %269 = vmatmul.f32.gmra.mxu0 %v55_v9  ;;  %617 = vmatmul.f32.gmra.mxu3 %v58_v10 }
  0x40   :  { %385 = vmatmul.f32.gmra.mxu1 %v56_v11 }
  0x45   :  { %504 = vmatmul.f32.gmra.mxu2 %v61_v12  ;;  %v117_v12 = vld [vmem:[#allocation2 + $0x230] sm:$0xff] }
  0x46   :  { %272 = vmatmul.f32.gmra.mxu0 %v59_v13  ;;  %620 = vmatmul.f32.gmra.mxu3 %v62_v14 }
  0x48   :  { %388 = vmatmul.f32.gmra.mxu1 %v60_v15  ;;  %v115_v15 = vld [vmem:[#allocation2 + $0x220] sm:$0xff] }
  0x4d   :  { %507 = vmatmul.f32.gmra.mxu2 %v65_v16  ;;  %v118_v16 = vld [vmem:[#allocation2 + $0x238] sm:$0xff] }
  0x4e   :  { %275 = vmatmul.f32.gmra.mxu0 %v63_v17  ;;  %623 = vmatmul.f32.gmra.mxu3 %v66_v18 }
  0x50   :  { %391 = vmatmul.f32.gmra.mxu1 %v64_v19  ;;  %v116_v19 = vld [vmem:[#allocation2 + $0x228] sm:$0xff] }
  0x55   :  { %510 = vmatmul.f32.gmra.mxu2 %v69_v20 }
  0x56   :  { %278 = vmatmul.f32.gmra.mxu0 %v67_v21  ;;  %626 = vmatmul.f32.gmra.mxu3 %v70_v22 }
  0x58   :  { %394 = vmatmul.f32.gmra.mxu1 %v68_v23 }
  0x5d   :  { %513 = vmatmul.f32.gmra.mxu2 %v73_v24  ;;  %v121_v24 = vld [vmem:[#allocation2 + $0x250] sm:$0xff] }
  0x5e   :  { %281 = vmatmul.f32.gmra.mxu0 %v71_v25  ;;  %629 = vmatmul.f32.gmra.mxu3 %v74_v26 }
  0x60   :  { %397 = vmatmul.f32.gmra.mxu1 %v72_v27  ;;  %v119_v27 = vld [vmem:[#allocation2 + $0x240] sm:$0xff] }
  0x65   :  { %516 = vmatmul.f32.gmra.mxu2 %v77_v28  ;;  %v122_v28 = vld [vmem:[#allocation2 + $0x258] sm:$0xff] }
  0x66   :  { %284 = vmatmul.f32.gmra.mxu0 %v75_v29  ;;  %632 = vmatmul.f32.gmra.mxu3 %v78_v30 }
  0x68   :  { %400 = vmatmul.f32.gmra.mxu1 %v76_v31  ;;  %v120_v31 = vld [vmem:[#allocation2 + $0x248] sm:$0xff] }
  0x6d   :  { %519 = vmatmul.f32.gmra.mxu2 %v81_v32 }
  0x6e   :  { %287 = vmatmul.f32.gmra.mxu0 %v79_v33  ;;  %635 = vmatmul.f32.gmra.mxu3 %v82_v34 }
  0x70   :  { %403 = vmatmul.f32.gmra.mxu1 %v80_v35 }
  0x75   :  { %522 = vmatmul.f32.gmra.mxu2 %v85_v36  ;;  %v125_v36 = vld [vmem:[#allocation2 + $0x270] sm:$0xff] }
  0x76   :  { %290 = vmatmul.f32.gmra.mxu0 %v83_v37  ;;  %638 = vmatmul.f32.gmra.mxu3 %v86_v38 }
  0x78   :  { %406 = vmatmul.f32.gmra.mxu1 %v84_v39  ;;  %v123_v39 = vld [vmem:[#allocation2 + $0x260] sm:$0xff] }
  0x7d   :  { %525 = vmatmul.f32.gmra.mxu2 %v89_v40  ;;  %v126_v40 = vld [vmem:[#allocation2 + $0x278] sm:$0xff] }
  0x7e   :  { %293 = vmatmul.f32.gmra.mxu0 %v87_v41  ;;  %641 = vmatmul.f32.gmra.mxu3 %v90_v42 }
  0x80   :  { %409 = vmatmul.f32.gmra.mxu1 %v88_v43  ;;  %v124_v43 = vld [vmem:[#allocation2 + $0x268] sm:$0xff] }
  0x85   :  { %528 = vmatmul.f32.gmra.mxu2 %v93_v44 }
  0x86   :  { %296 = vmatmul.f32.gmra.mxu0 %v91_v45  ;;  %644 = vmatmul.f32.gmra.mxu3 %v94_v46 }
  0x88   :  { %412 = vmatmul.f32.gmra.mxu1 %v92_v47 }
  0x8d   :  { %531 = vmatmul.f32.gmra.mxu2 %v97_v48  ;;  %v129_v48 = vld [vmem:[#allocation2 + $0x290] sm:$0xff] }
  0x8e   :  { %299 = vmatmul.f32.gmra.mxu0 %v95_v49  ;;  %647 = vmatmul.f32.gmra.mxu3 %v98_v50 }
  0x90   :  { %415 = vmatmul.f32.gmra.mxu1 %v96_v51  ;;  %v127_v51 = vld [vmem:[#allocation2 + $0x280] sm:$0xff] }
  0x95   :  { %534 = vmatmul.f32.gmra.mxu2 %v101_v52  ;;  %v130_v52 = vld [vmem:[#allocation2 + $0x298] sm:$0xff] }
  0x96   :  { %302 = vmatmul.f32.gmra.mxu0 %v99_v53  ;;  %650 = vmatmul.f32.gmra.mxu3 %v102_v54 }
  0x98   :  { %418 = vmatmul.f32.gmra.mxu1 %v100_v55  ;;  %v128_v55 = vld [vmem:[#allocation2 + $0x288] sm:$0xff] }
  0x9d   :  { %537 = vmatmul.f32.gmra.mxu2 %v105_v56 }
  0x9e   :  { %305 = vmatmul.f32.gmra.mxu0 %v103_v57  ;;  %653 = vmatmul.f32.gmra.mxu3 %v106_v58 }
  0xa0   :  { %421 = vmatmul.f32.gmra.mxu1 %v104_v59 }
  0xa5   :  { %540 = vmatmul.f32.gmra.mxu2 %v109_v60  ;;  %v133_v60 = vld [vmem:[#allocation2 + $0x2b0] sm:$0xff] }
  0xa6   :  { %308 = vmatmul.f32.gmra.mxu0 %v107_v61  ;;  %656 = vmatmul.f32.gmra.mxu3 %v110_v62 }
  0xa8   :  { %424 = vmatmul.f32.gmra.mxu1 %v108_v63  ;;  %v131_v63 = vld [vmem:[#allocation2 + $0x2a0] sm:$0xff] }
  0xab   :  { %v264_v2 = vpop.f32.mrf.mxu0 }
  0xac   :  { %v265_v5 = vadd.f32 %v889_v0, %v264_v2 }
  0xad   :  { %543 = vmatmul.f32.gmra.mxu2 %v113_v1  ;;  %v380_v6 = vpop.f32.mrf.mxu1  ;;  %v134_v1 = vld [vmem:[#allocation2 + $0x2b8] sm:$0xff] }
  0xae   :  { %v381_v8 = vadd.f32 %v380_v6, %v265_v5  ;;  %311 = vmatmul.f32.gmra.mxu0 %v111_v3  ;;  %659 = vmatmul.f32.gmra.mxu3 %v114_v4  ;;  %v132_v4 = vld [vmem:[#allocation2 + $0x2a8] sm:$0xff] }
  0xb0   :  { %v496_v9 = vpop.f32.mrf.mxu2  ;;  %427 = vmatmul.f32.gmra.mxu1 %v112_v7 }
  0xb1   :  { %v497_v10 = vadd.f32 %v496_v9, %v381_v8  ;;  %v612_v11 = vpop.f32.mrf.mxu3  ;;  %v137_v9 = vld [vmem:[#allocation2 + $0x2d0] sm:$0xff] }
  0xb3   :  { %v613_v13 = vadd.f32 %v612_v11, %v497_v10  ;;  %v267_v14 = vpop.f32.mrf.mxu0 }
  0xb4   :  { %v268_v17 = vadd.f32 %v889_v0, %v267_v14 }
  0xb5   :  { %711 = vst [vmem:[#allocation7] sm:$0xff] %v613_v13  ;;  %546 = vmatmul.f32.gmra.mxu2 %v117_v12  ;;  %v383_v18 = vpop.f32.mrf.mxu1  ;;  %v135_v12 = vld [vmem:[#allocation2 + $0x2c0] sm:$0xff]  ;;  %v138_v13 = vld [vmem:[#allocation2 + $0x2d8] sm:$0xff] }
  0xb6   :  { %v384_v20 = vadd.f32 %v383_v18, %v268_v17  ;;  %314 = vmatmul.f32.gmra.mxu0 %v115_v15  ;;  %662 = vmatmul.f32.gmra.mxu3 %v118_v16  ;;  %v136_v16 = vld [vmem:[#allocation2 + $0x2c8] sm:$0xff] }
  0xb8   :  { %v499_v21 = vpop.f32.mrf.mxu2  ;;  %430 = vmatmul.f32.gmra.mxu1 %v116_v19 }
  0xb9   :  { %v500_v22 = vadd.f32 %v499_v21, %v384_v20  ;;  %v615_v23 = vpop.f32.mrf.mxu3  ;;  %v141_v21 = vld [vmem:[#allocation2 + $0x2f0] sm:$0xff] }
  0xbb   :  { %v616_v25 = vadd.f32 %v615_v23, %v500_v22  ;;  %v270_v26 = vpop.f32.mrf.mxu0 }
  0xbc   :  { %v271_v29 = vadd.f32 %v889_v0, %v270_v26 }
  0xbd   :  { %712 = vst [vmem:[#allocation7 + $0x8] sm:$0xff] %v616_v25  ;;  %549 = vmatmul.f32.gmra.mxu2 %v121_v24  ;;  %v386_v30 = vpop.f32.mrf.mxu1  ;;  %v139_v24 = vld [vmem:[#allocation2 + $0x2e0] sm:$0xff]  ;;  %v142_v25 = vld [vmem:[#allocation2 + $0x2f8] sm:$0xff] }
  0xbe   :  { %v387_v32 = vadd.f32 %v386_v30, %v271_v29  ;;  %317 = vmatmul.f32.gmra.mxu0 %v119_v27  ;;  %665 = vmatmul.f32.gmra.mxu3 %v122_v28  ;;  %v140_v28 = vld [vmem:[#allocation2 + $0x2e8] sm:$0xff] }
  0xc0   :  { %v502_v33 = vpop.f32.mrf.mxu2  ;;  %433 = vmatmul.f32.gmra.mxu1 %v120_v31 }
  0xc1   :  { %v503_v34 = vadd.f32 %v502_v33, %v387_v32  ;;  %v618_v35 = vpop.f32.mrf.mxu3  ;;  %v145_v33 = vld [vmem:[#allocation2 + $0x310] sm:$0xff] }
  0xc3   :  { %v619_v37 = vadd.f32 %v618_v35, %v503_v34  ;;  %v273_v38 = vpop.f32.mrf.mxu0 }
  0xc4   :  { %v274_v41 = vadd.f32 %v889_v0, %v273_v38 }
  0xc5   :  { %713 = vst [vmem:[#allocation7 + $0x10] sm:$0xff] %v619_v37  ;;  %552 = vmatmul.f32.gmra.mxu2 %v125_v36  ;;  %v389_v42 = vpop.f32.mrf.mxu1  ;;  %v143_v36 = vld [vmem:[#allocation2 + $0x300] sm:$0xff]  ;;  %v146_v37 = vld [vmem:[#allocation2 + $0x318] sm:$0xff] }
  0xc6   :  { %v390_v44 = vadd.f32 %v389_v42, %v274_v41  ;;  %320 = vmatmul.f32.gmra.mxu0 %v123_v39  ;;  %668 = vmatmul.f32.gmra.mxu3 %v126_v40  ;;  %v144_v40 = vld [vmem:[#allocation2 + $0x308] sm:$0xff] }
  0xc8   :  { %v505_v45 = vpop.f32.mrf.mxu2  ;;  %436 = vmatmul.f32.gmra.mxu1 %v124_v43 }
  0xc9   :  { %v506_v46 = vadd.f32 %v505_v45, %v390_v44  ;;  %v621_v47 = vpop.f32.mrf.mxu3  ;;  %v149_v45 = vld [vmem:[#allocation2 + $0x330] sm:$0xff] }
  0xcb   :  { %v622_v49 = vadd.f32 %v621_v47, %v506_v46  ;;  %v276_v50 = vpop.f32.mrf.mxu0 }
  0xcc   :  { %v277_v53 = vadd.f32 %v889_v0, %v276_v50 }
  0xcd   :  { %714 = vst [vmem:[#allocation7 + $0x18] sm:$0xff] %v622_v49  ;;  %555 = vmatmul.f32.gmra.mxu2 %v129_v48  ;;  %v392_v54 = vpop.f32.mrf.mxu1  ;;  %v147_v48 = vld [vmem:[#allocation2 + $0x320] sm:$0xff]  ;;  %v150_v49 = vld [vmem:[#allocation2 + $0x338] sm:$0xff] }
  0xce   :  { %v393_v56 = vadd.f32 %v392_v54, %v277_v53  ;;  %323 = vmatmul.f32.gmra.mxu0 %v127_v51  ;;  %671 = vmatmul.f32.gmra.mxu3 %v130_v52  ;;  %v148_v52 = vld [vmem:[#allocation2 + $0x328] sm:$0xff] }
  0xd0   :  { %v508_v57 = vpop.f32.mrf.mxu2  ;;  %439 = vmatmul.f32.gmra.mxu1 %v128_v55 }
  0xd1   :  { %v509_v58 = vadd.f32 %v508_v57, %v393_v56  ;;  %v624_v59 = vpop.f32.mrf.mxu3  ;;  %v153_v57 = vld [vmem:[#allocation2 + $0x350] sm:$0xff] }
  0xd3   :  { %v625_v61 = vadd.f32 %v624_v59, %v509_v58  ;;  %v279_v62 = vpop.f32.mrf.mxu0 }
  0xd4   :  { %v280_v2 = vadd.f32 %v889_v0, %v279_v62 }
  0xd5   :  { %715 = vst [vmem:[#allocation7 + $0x20] sm:$0xff] %v625_v61  ;;  %558 = vmatmul.f32.gmra.mxu2 %v133_v60  ;;  %v395_v3 = vpop.f32.mrf.mxu1  ;;  %v151_v60 = vld [vmem:[#allocation2 + $0x340] sm:$0xff]  ;;  %v154_v61 = vld [vmem:[#allocation2 + $0x358] sm:$0xff] }
  0xd6   :  { %v396_v5 = vadd.f32 %v395_v3, %v280_v2  ;;  %326 = vmatmul.f32.gmra.mxu0 %v131_v63  ;;  %674 = vmatmul.f32.gmra.mxu3 %v134_v1  ;;  %v152_v1 = vld [vmem:[#allocation2 + $0x348] sm:$0xff] }
  0xd8   :  { %v511_v6 = vpop.f32.mrf.mxu2  ;;  %442 = vmatmul.f32.gmra.mxu1 %v132_v4 }
  0xd9   :  { %v512_v7 = vadd.f32 %v511_v6, %v396_v5  ;;  %v627_v8 = vpop.f32.mrf.mxu3  ;;  %v157_v6 = vld [vmem:[#allocation2 + $0x370] sm:$0xff] }
  0xdb   :  { %v628_v10 = vadd.f32 %v627_v8, %v512_v7  ;;  %v282_v11 = vpop.f32.mrf.mxu0 }
  0xdc   :  { %v283_v14 = vadd.f32 %v889_v0, %v282_v11 }
  0xdd   :  { %716 = vst [vmem:[#allocation7 + $0x28] sm:$0xff] %v628_v10  ;;  %561 = vmatmul.f32.gmra.mxu2 %v137_v9  ;;  %v398_v15 = vpop.f32.mrf.mxu1  ;;  %v155_v9 = vld [vmem:[#allocation2 + $0x360] sm:$0xff]  ;;  %v158_v10 = vld [vmem:[#allocation2 + $0x378] sm:$0xff] }
  0xde   :  { %v399_v17 = vadd.f32 %v398_v15, %v283_v14  ;;  %329 = vmatmul.f32.gmra.mxu0 %v135_v12  ;;  %677 = vmatmul.f32.gmra.mxu3 %v138_v13  ;;  %v156_v13 = vld [vmem:[#allocation2 + $0x368] sm:$0xff] }
  0xe0   :  { %v514_v18 = vpop.f32.mrf.mxu2  ;;  %445 = vmatmul.f32.gmra.mxu1 %v136_v16 }
  0xe1   :  { %v515_v19 = vadd.f32 %v514_v18, %v399_v17  ;;  %v630_v20 = vpop.f32.mrf.mxu3  ;;  %v161_v18 = vld [vmem:[#allocation2 + $0x390] sm:$0xff] }
  0xe3   :  { %v631_v22 = vadd.f32 %v630_v20, %v515_v19  ;;  %v285_v23 = vpop.f32.mrf.mxu0 }
  0xe4   :  { %v286_v26 = vadd.f32 %v889_v0, %v285_v23 }
  0xe5   :  { %717 = vst [vmem:[#allocation7 + $0x30] sm:$0xff] %v631_v22  ;;  %564 = vmatmul.f32.gmra.mxu2 %v141_v21  ;;  %v401_v27 = vpop.f32.mrf.mxu1  ;;  %v159_v21 = vld [vmem:[#allocation2 + $0x380] sm:$0xff]  ;;  %v162_v22 = vld [vmem:[#allocation2 + $0x398] sm:$0xff] }
  0xe6   :  { %v402_v29 = vadd.f32 %v401_v27, %v286_v26  ;;  %332 = vmatmul.f32.gmra.mxu0 %v139_v24  ;;  %680 = vmatmul.f32.gmra.mxu3 %v142_v25  ;;  %v160_v25 = vld [vmem:[#allocation2 + $0x388] sm:$0xff] }
  0xe8   :  { %v517_v30 = vpop.f32.mrf.mxu2  ;;  %448 = vmatmul.f32.gmra.mxu1 %v140_v28 }
  0xe9   :  { %v518_v31 = vadd.f32 %v517_v30, %v402_v29  ;;  %v633_v32 = vpop.f32.mrf.mxu3  ;;  %v165_v30 = vld [vmem:[#allocation2 + $0x3b0] sm:$0xff] }
  0xeb   :  { %v634_v34 = vadd.f32 %v633_v32, %v518_v31  ;;  %v288_v35 = vpop.f32.mrf.mxu0 }
  0xec   :  { %v289_v38 = vadd.f32 %v889_v0, %v288_v35 }
  0xed   :  { %718 = vst [vmem:[#allocation7 + $0x38] sm:$0xff] %v634_v34  ;;  %567 = vmatmul.f32.gmra.mxu2 %v145_v33  ;;  %v404_v39 = vpop.f32.mrf.mxu1  ;;  %v163_v33 = vld [vmem:[#allocation2 + $0x3a0] sm:$0xff]  ;;  %v166_v34 = vld [vmem:[#allocation2 + $0x3b8] sm:$0xff] }
  0xee   :  { %v405_v41 = vadd.f32 %v404_v39, %v289_v38  ;;  %335 = vmatmul.f32.gmra.mxu0 %v143_v36  ;;  %683 = vmatmul.f32.gmra.mxu3 %v146_v37  ;;  %v164_v37 = vld [vmem:[#allocation2 + $0x3a8] sm:$0xff] }
  0xf0   :  { %v520_v42 = vpop.f32.mrf.mxu2  ;;  %451 = vmatmul.f32.gmra.mxu1 %v144_v40 }
  0xf1   :  { %v521_v43 = vadd.f32 %v520_v42, %v405_v41  ;;  %v636_v44 = vpop.f32.mrf.mxu3  ;;  %v169_v42 = vld [vmem:[#allocation2 + $0x3d0] sm:$0xff] }
  0xf3   :  { %v637_v46 = vadd.f32 %v636_v44, %v521_v43  ;;  %v291_v47 = vpop.f32.mrf.mxu0 }
  0xf4   :  { %v292_v50 = vadd.f32 %v889_v0, %v291_v47 }
  0xf5   :  { %719 = vst [vmem:[#allocation7 + $0x40] sm:$0xff] %v637_v46  ;;  %570 = vmatmul.f32.gmra.mxu2 %v149_v45  ;;  %v407_v51 = vpop.f32.mrf.mxu1  ;;  %v167_v45 = vld [vmem:[#allocation2 + $0x3c0] sm:$0xff]  ;;  %v170_v46 = vld [vmem:[#allocation2 + $0x3d8] sm:$0xff] }
  0xf6   :  { %v408_v53 = vadd.f32 %v407_v51, %v292_v50  ;;  %338 = vmatmul.f32.gmra.mxu0 %v147_v48  ;;  %686 = vmatmul.f32.gmra.mxu3 %v150_v49  ;;  %v168_v49 = vld [vmem:[#allocation2 + $0x3c8] sm:$0xff] }
  0xf8   :  { %v523_v54 = vpop.f32.mrf.mxu2  ;;  %454 = vmatmul.f32.gmra.mxu1 %v148_v52 }
  0xf9   :  { %v524_v55 = vadd.f32 %v523_v54, %v408_v53  ;;  %v639_v56 = vpop.f32.mrf.mxu3  ;;  %v173_v54 = vld [vmem:[#allocation2 + $0x3f0] sm:$0xff] }
  0xfb   :  { %v640_v58 = vadd.f32 %v639_v56, %v524_v55  ;;  %v294_v59 = vpop.f32.mrf.mxu0 }
  0xfc   :  { %v295_v62 = vadd.f32 %v889_v0, %v294_v59 }
  0xfd   :  { %720 = vst [vmem:[#allocation7 + $0x48] sm:$0xff] %v640_v58  ;;  %573 = vmatmul.f32.gmra.mxu2 %v153_v57  ;;  %v410_v63 = vpop.f32.mrf.mxu1  ;;  %v171_v57 = vld [vmem:[#allocation2 + $0x3e0] sm:$0xff]  ;;  %v174_v58 = vld [vmem:[#allocation2 + $0x3f8] sm:$0xff] }
  0xfe   :  { %v411_v2 = vadd.f32 %v410_v63, %v295_v62  ;;  %341 = vmatmul.f32.gmra.mxu0 %v151_v60  ;;  %689 = vmatmul.f32.gmra.mxu3 %v154_v61  ;;  %v172_v61 = vld [vmem:[#allocation2 + $0x3e8] sm:$0xff] }
 0x100   :  { %v526_v3 = vpop.f32.mrf.mxu2  ;;  %457 = vmatmul.f32.gmra.mxu1 %v152_v1 }
 0x101   :  { %v527_v4 = vadd.f32 %v526_v3, %v411_v2  ;;  %v642_v5 = vpop.f32.mrf.mxu3  ;;  %v177_v3 = vld [vmem:[#allocation2 + $0x410] sm:$0xff] }
 0x103   :  { %v643_v7 = vadd.f32 %v642_v5, %v527_v4  ;;  %v297_v8 = vpop.f32.mrf.mxu0 }
 0x104   :  { %v298_v11 = vadd.f32 %v889_v0, %v297_v8 }
 0x105   :  { %721 = vst [vmem:[#allocation7 + $0x50] sm:$0xff] %v643_v7  ;;  %576 = vmatmul.f32.gmra.mxu2 %v157_v6  ;;  %v413_v12 = vpop.f32.mrf.mxu1  ;;  %v175_v6 = vld [vmem:[#allocation2 + $0x400] sm:$0xff]  ;;  %v178_v7 = vld [vmem:[#allocation2 + $0x418] sm:$0xff] }
 0x106   :  { %v414_v14 = vadd.f32 %v413_v12, %v298_v11  ;;  %344 = vmatmul.f32.gmra.mxu0 %v155_v9  ;;  %692 = vmatmul.f32.gmra.mxu3 %v158_v10  ;;  %v176_v10 = vld [vmem:[#allocation2 + $0x408] sm:$0xff] }
 0x108   :  { %v529_v15 = vpop.f32.mrf.mxu2  ;;  %460 = vmatmul.f32.gmra.mxu1 %v156_v13 }
 0x109   :  { %v530_v16 = vadd.f32 %v529_v15, %v414_v14  ;;  %v645_v17 = vpop.f32.mrf.mxu3 }
 0x10b   :  { %v646_v19 = vadd.f32 %v645_v17, %v530_v16  ;;  %v300_v20 = vpop.f32.mrf.mxu0 }
 0x10c   :  { %v301_v23 = vadd.f32 %v889_v0, %v300_v20 }
 0x10d   :  { %722 = vst [vmem:[#allocation7 + $0x58] sm:$0xff] %v646_v19  ;;  %579 = vmatmul.f32.gmra.mxu2 %v161_v18  ;;  %v416_v24 = vpop.f32.mrf.mxu1 }
 0x10e   :  { %v417_v26 = vadd.f32 %v416_v24, %v301_v23  ;;  %347 = vmatmul.f32.gmra.mxu0 %v159_v21  ;;  %695 = vmatmul.f32.gmra.mxu3 %v162_v22 }
 0x110   :  { %v532_v27 = vpop.f32.mrf.mxu2  ;;  %463 = vmatmul.f32.gmra.mxu1 %v160_v25 }
 0x111   :  { %v533_v28 = vadd.f32 %v532_v27, %v417_v26  ;;  %v648_v29 = vpop.f32.mrf.mxu3 }
 0x113   :  { %v649_v31 = vadd.f32 %v648_v29, %v533_v28  ;;  %v303_v32 = vpop.f32.mrf.mxu0 }
 0x114   :  { %v304_v35 = vadd.f32 %v889_v0, %v303_v32 }
 0x115   :  { %723 = vst [vmem:[#allocation7 + $0x60] sm:$0xff] %v649_v31  ;;  %582 = vmatmul.f32.gmra.mxu2 %v165_v30  ;;  %v419_v36 = vpop.f32.mrf.mxu1 }
 0x116   :  { %v420_v38 = vadd.f32 %v419_v36, %v304_v35  ;;  %350 = vmatmul.f32.gmra.mxu0 %v163_v33  ;;  %698 = vmatmul.f32.gmra.mxu3 %v166_v34 }
 0x118   :  { %v535_v39 = vpop.f32.mrf.mxu2  ;;  %466 = vmatmul.f32.gmra.mxu1 %v164_v37 }
 0x119   :  { %v536_v40 = vadd.f32 %v535_v39, %v420_v38  ;;  %v651_v41 = vpop.f32.mrf.mxu3 }
 0x11b   :  { %v652_v43 = vadd.f32 %v651_v41, %v536_v40  ;;  %v306_v44 = vpop.f32.mrf.mxu0 }
 0x11c   :  { %v307_v47 = vadd.f32 %v889_v0, %v306_v44 }
 0x11d   :  { %724 = vst [vmem:[#allocation7 + $0x68] sm:$0xff] %v652_v43  ;;  %585 = vmatmul.f32.gmra.mxu2 %v169_v42  ;;  %v422_v48 = vpop.f32.mrf.mxu1 }
 0x11e   :  { %v423_v50 = vadd.f32 %v422_v48, %v307_v47  ;;  %353 = vmatmul.f32.gmra.mxu0 %v167_v45  ;;  %701 = vmatmul.f32.gmra.mxu3 %v170_v46 }
 0x120   :  { %v538_v51 = vpop.f32.mrf.mxu2  ;;  %469 = vmatmul.f32.gmra.mxu1 %v168_v49 }
 0x121   :  { %v539_v52 = vadd.f32 %v538_v51, %v423_v50  ;;  %v654_v53 = vpop.f32.mrf.mxu3 }
 0x123   :  { %v655_v55 = vadd.f32 %v654_v53, %v539_v52  ;;  %v309_v56 = vpop.f32.mrf.mxu0 }
 0x124   :  { %v310_v59 = vadd.f32 %v889_v0, %v309_v56 }
 0x125   :  { %725 = vst [vmem:[#allocation7 + $0x70] sm:$0xff] %v655_v55  ;;  %588 = vmatmul.f32.gmra.mxu2 %v173_v54  ;;  %v425_v60 = vpop.f32.mrf.mxu1 }
 0x126   :  { %v426_v62 = vadd.f32 %v425_v60, %v310_v59  ;;  %356 = vmatmul.f32.gmra.mxu0 %v171_v57  ;;  %704 = vmatmul.f32.gmra.mxu3 %v174_v58 }
 0x128   :  { %v541_v63 = vpop.f32.mrf.mxu2  ;;  %472 = vmatmul.f32.gmra.mxu1 %v172_v61 }
 0x129   :  { %v542_v1 = vadd.f32 %v541_v63, %v426_v62  ;;  %v657_v2 = vpop.f32.mrf.mxu3 }
 0x12b   :  { %v658_v4 = vadd.f32 %v657_v2, %v542_v1  ;;  %v312_v5 = vpop.f32.mrf.mxu0 }
 0x12c   :  { %v313_v8 = vadd.f32 %v889_v0, %v312_v5 }
 0x12d   :  { %726 = vst [vmem:[#allocation7 + $0x78] sm:$0xff] %v658_v4  ;;  %591 = vmatmul.f32.gmra.mxu2 %v177_v3  ;;  %v428_v9 = vpop.f32.mrf.mxu1 }
 0x12e   :  { %v429_v11 = vadd.f32 %v428_v9, %v313_v8  ;;  %359 = vmatmul.f32.gmra.mxu0 %v175_v6  ;;  %707 = vmatmul.f32.gmra.mxu3 %v178_v7 }
 0x130   :  { %v544_v12 = vpop.f32.mrf.mxu2  ;;  %475 = vmatmul.f32.gmra.mxu1 %v176_v10 }
 0x131   :  { %v545_v13 = vadd.f32 %v544_v12, %v429_v11  ;;  %v660_v14 = vpop.f32.mrf.mxu3 }
 0x133   :  { %v661_v15 = vadd.f32 %v660_v14, %v545_v13  ;;  %v315_v16 = vpop.f32.mrf.mxu0 }
 0x134   :  { %v316_v17 = vadd.f32 %v889_v0, %v315_v16 }
 0x135   :  { %727 = vst [vmem:[#allocation7 + $0x80] sm:$0xff] %v661_v15  ;;  %v431_v18 = vpop.f32.mrf.mxu1 }
 0x136   :  { %v432_v19 = vadd.f32 %v431_v18, %v316_v17 }
 0x138   :  { %v547_v20 = vpop.f32.mrf.mxu2 }
 0x139   :  { %v548_v21 = vadd.f32 %v547_v20, %v432_v19  ;;  %v663_v22 = vpop.f32.mrf.mxu3 }
 0x13b   :  { %v664_v23 = vadd.f32 %v663_v22, %v548_v21  ;;  %v318_v24 = vpop.f32.mrf.mxu0 }
 0x13c   :  { %v319_v25 = vadd.f32 %v889_v0, %v318_v24 }
 0x13d   :  { %728 = vst [vmem:[#allocation7 + $0x88] sm:$0xff] %v664_v23  ;;  %v434_v26 = vpop.f32.mrf.mxu1 }
 0x13e   :  { %v435_v27 = vadd.f32 %v434_v26, %v319_v25 }
 0x140   :  { %v550_v28 = vpop.f32.mrf.mxu2 }
 0x141   :  { %v551_v29 = vadd.f32 %v550_v28, %v435_v27  ;;  %v666_v30 = vpop.f32.mrf.mxu3 }
 0x143   :  { %v667_v31 = vadd.f32 %v666_v30, %v551_v29  ;;  %v321_v32 = vpop.f32.mrf.mxu0 }
 0x144   :  { %v322_v33 = vadd.f32 %v889_v0, %v321_v32 }
 0x145   :  { %729 = vst [vmem:[#allocation7 + $0x90] sm:$0xff] %v667_v31  ;;  %v437_v34 = vpop.f32.mrf.mxu1 }
 0x146   :  { %v438_v35 = vadd.f32 %v437_v34, %v322_v33 }
 0x148   :  { %v553_v36 = vpop.f32.mrf.mxu2 }
 0x149   :  { %v554_v37 = vadd.f32 %v553_v36, %v438_v35  ;;  %v669_v38 = vpop.f32.mrf.mxu3 }
 0x14b   :  { %v670_v39 = vadd.f32 %v669_v38, %v554_v37  ;;  %v324_v40 = vpop.f32.mrf.mxu0 }
 0x14c   :  { %v325_v41 = vadd.f32 %v889_v0, %v324_v40 }
 0x14d   :  { %730 = vst [vmem:[#allocation7 + $0x98] sm:$0xff] %v670_v39  ;;  %v440_v42 = vpop.f32.mrf.mxu1 }
 0x14e   :  { %v441_v43 = vadd.f32 %v440_v42, %v325_v41 }
 0x150   :  { %v556_v44 = vpop.f32.mrf.mxu2 }
 0x151   :  { %v557_v45 = vadd.f32 %v556_v44, %v441_v43  ;;  %v672_v46 = vpop.f32.mrf.mxu3 }
 0x153   :  { %v673_v47 = vadd.f32 %v672_v46, %v557_v45  ;;  %v327_v48 = vpop.f32.mrf.mxu0 }
 0x154   :  { %v328_v49 = vadd.f32 %v889_v0, %v327_v48 }
 0x155   :  { %731 = vst [vmem:[#allocation7 + $0xa0] sm:$0xff] %v673_v47  ;;  %v443_v50 = vpop.f32.mrf.mxu1 }
 0x156   :  { %v444_v51 = vadd.f32 %v443_v50, %v328_v49 }
 0x158   :  { %v559_v52 = vpop.f32.mrf.mxu2 }
 0x159   :  { %v560_v53 = vadd.f32 %v559_v52, %v444_v51  ;;  %v675_v54 = vpop.f32.mrf.mxu3 }
 0x15b   :  { %v676_v55 = vadd.f32 %v675_v54, %v560_v53  ;;  %v330_v56 = vpop.f32.mrf.mxu0 }
 0x15c   :  { %v331_v57 = vadd.f32 %v889_v0, %v330_v56 }
 0x15d   :  { %732 = vst [vmem:[#allocation7 + $0xa8] sm:$0xff] %v676_v55  ;;  %v446_v58 = vpop.f32.mrf.mxu1 }
 0x15e   :  { %v447_v59 = vadd.f32 %v446_v58, %v331_v57 }
 0x160   :  { %v562_v60 = vpop.f32.mrf.mxu2 }
 0x161   :  { %v563_v61 = vadd.f32 %v562_v60, %v447_v59  ;;  %v678_v62 = vpop.f32.mrf.mxu3 }
 0x163   :  { %v679_v63 = vadd.f32 %v678_v62, %v563_v61  ;;  %v333_v1 = vpop.f32.mrf.mxu0 }
 0x164   :  { %v334_v2 = vadd.f32 %v889_v0, %v333_v1 }
 0x165   :  { %733 = vst [vmem:[#allocation7 + $0xb0] sm:$0xff] %v679_v63  ;;  %v449_v3 = vpop.f32.mrf.mxu1 }
 0x166   :  { %v450_v4 = vadd.f32 %v449_v3, %v334_v2 }
 0x168   :  { %v565_v5 = vpop.f32.mrf.mxu2 }
 0x169   :  { %v566_v6 = vadd.f32 %v565_v5, %v450_v4  ;;  %v681_v7 = vpop.f32.mrf.mxu3 }
 0x16b   :  { %v682_v8 = vadd.f32 %v681_v7, %v566_v6  ;;  %v336_v9 = vpop.f32.mrf.mxu0 }
 0x16c   :  { %v337_v10 = vadd.f32 %v889_v0, %v336_v9 }
 0x16d   :  { %734 = vst [vmem:[#allocation7 + $0xb8] sm:$0xff] %v682_v8  ;;  %v452_v11 = vpop.f32.mrf.mxu1 }
 0x16e   :  { %v453_v12 = vadd.f32 %v452_v11, %v337_v10 }
 0x170   :  { %v568_v13 = vpop.f32.mrf.mxu2 }
 0x171   :  { %v569_v14 = vadd.f32 %v568_v13, %v453_v12  ;;  %v684_v15 = vpop.f32.mrf.mxu3 }
 0x173   :  { %v685_v16 = vadd.f32 %v684_v15, %v569_v14  ;;  %v339_v17 = vpop.f32.mrf.mxu0 }
 0x174   :  { %v340_v18 = vadd.f32 %v889_v0, %v339_v17 }
 0x175   :  { %735 = vst [vmem:[#allocation7 + $0xc0] sm:$0xff] %v685_v16  ;;  %v455_v19 = vpop.f32.mrf.mxu1 }
 0x176   :  { %v456_v20 = vadd.f32 %v455_v19, %v340_v18 }
 0x178   :  { %v571_v21 = vpop.f32.mrf.mxu2 }
 0x179   :  { %v572_v22 = vadd.f32 %v571_v21, %v456_v20  ;;  %v687_v23 = vpop.f32.mrf.mxu3 }
 0x17b   :  { %v688_v24 = vadd.f32 %v687_v23, %v572_v22  ;;  %v342_v25 = vpop.f32.mrf.mxu0 }
 0x17c   :  { %v343_v26 = vadd.f32 %v889_v0, %v342_v25 }
 0x17d   :  { %736 = vst [vmem:[#allocation7 + $0xc8] sm:$0xff] %v688_v24  ;;  %v458_v27 = vpop.f32.mrf.mxu1 }
 0x17e   :  { %v459_v28 = vadd.f32 %v458_v27, %v343_v26 }
 0x180   :  { %v574_v29 = vpop.f32.mrf.mxu2 }
 0x181   :  { %v575_v30 = vadd.f32 %v574_v29, %v459_v28  ;;  %v690_v31 = vpop.f32.mrf.mxu3 }
 0x183   :  { %v691_v32 = vadd.f32 %v690_v31, %v575_v30  ;;  %v345_v33 = vpop.f32.mrf.mxu0 }
 0x184   :  { %v346_v34 = vadd.f32 %v889_v0, %v345_v33 }
 0x185   :  { %737 = vst [vmem:[#allocation7 + $0xd0] sm:$0xff] %v691_v32  ;;  %v461_v35 = vpop.f32.mrf.mxu1 }
 0x186   :  { %v462_v36 = vadd.f32 %v461_v35, %v346_v34 }
 0x188   :  { %v577_v37 = vpop.f32.mrf.mxu2 }
 0x189   :  { %v578_v38 = vadd.f32 %v577_v37, %v462_v36  ;;  %v693_v39 = vpop.f32.mrf.mxu3 }
 0x18b   :  { %v694_v40 = vadd.f32 %v693_v39, %v578_v38  ;;  %v348_v41 = vpop.f32.mrf.mxu0 }
 0x18c   :  { %v349_v42 = vadd.f32 %v889_v0, %v348_v41 }
 0x18d   :  { %738 = vst [vmem:[#allocation7 + $0xd8] sm:$0xff] %v694_v40  ;;  %v464_v43 = vpop.f32.mrf.mxu1 }
 0x18e   :  { %v465_v44 = vadd.f32 %v464_v43, %v349_v42 }
 0x190   :  { %v580_v45 = vpop.f32.mrf.mxu2 }
 0x191   :  { %v581_v46 = vadd.f32 %v580_v45, %v465_v44  ;;  %v696_v47 = vpop.f32.mrf.mxu3 }
 0x193   :  { %v697_v48 = vadd.f32 %v696_v47, %v581_v46  ;;  %v351_v49 = vpop.f32.mrf.mxu0 }
 0x194   :  { %v352_v50 = vadd.f32 %v889_v0, %v351_v49 }
 0x195   :  { %739 = vst [vmem:[#allocation7 + $0xe0] sm:$0xff] %v697_v48  ;;  %v467_v51 = vpop.f32.mrf.mxu1 }
 0x196   :  { %v468_v52 = vadd.f32 %v467_v51, %v352_v50 }
 0x198   :  { %v583_v53 = vpop.f32.mrf.mxu2 }
 0x199   :  { %v584_v54 = vadd.f32 %v583_v53, %v468_v52  ;;  %v699_v55 = vpop.f32.mrf.mxu3 }
 0x19b   :  { %v700_v56 = vadd.f32 %v699_v55, %v584_v54  ;;  %v354_v57 = vpop.f32.mrf.mxu0 }
 0x19c   :  { %v355_v58 = vadd.f32 %v889_v0, %v354_v57 }
 0x19d   :  { %740 = vst [vmem:[#allocation7 + $0xe8] sm:$0xff] %v700_v56  ;;  %v470_v59 = vpop.f32.mrf.mxu1 }
 0x19e   :  { %v471_v60 = vadd.f32 %v470_v59, %v355_v58 }
 0x1a0   :  { %v586_v61 = vpop.f32.mrf.mxu2 }
 0x1a1   :  { %v587_v62 = vadd.f32 %v586_v61, %v471_v60  ;;  %v702_v63 = vpop.f32.mrf.mxu3 }
 0x1a3   :  { %v703_v1 = vadd.f32 %v702_v63, %v587_v62  ;;  %v357_v2 = vpop.f32.mrf.mxu0 }
 0x1a4   :  { %v358_v3 = vadd.f32 %v889_v0, %v357_v2 }
 0x1a5   :  { %741 = vst [vmem:[#allocation7 + $0xf0] sm:$0xff] %v703_v1  ;;  %v473_v4 = vpop.f32.mrf.mxu1 }
 0x1a6   :  { %v474_v5 = vadd.f32 %v473_v4, %v358_v3 }
 0x1a8   :  { %v589_v6 = vpop.f32.mrf.mxu2 }
 0x1a9   :  { %v590_v7 = vadd.f32 %v589_v6, %v474_v5  ;;  %v705_v8 = vpop.f32.mrf.mxu3 }
 0x1ab   :  { %v706_v9 = vadd.f32 %v705_v8, %v590_v7  ;;  %v360_v10 = vpop.f32.mrf.mxu0 }
 0x1ac   :  { %v361_v11 = vadd.f32 %v889_v0, %v360_v10 }
 0x1ad   :  { %742 = vst [vmem:[#allocation7 + $0xf8] sm:$0xff] %v706_v9  ;;  %v476_v12 = vpop.f32.mrf.mxu1 }
 0x1ae   :  { %v477_v13 = vadd.f32 %v476_v12, %v361_v11 }
 0x1b0   :  { %v592_v14 = vpop.f32.mrf.mxu2 }
 0x1b1   :  { %v593_v15 = vadd.f32 %v592_v14, %v477_v13  ;;  %v708_v16 = vpop.f32.mrf.mxu3 }
 0x1b3   :  { %v709_v17 = vadd.f32 %v708_v16, %v593_v15 }
 0x1b5   :  { %743 = vst [vmem:[#allocation7 + $0x100] sm:$0xff] %v709_v17 }
 0x1b6   :  { %756 = dma.vmem_to_hbm [thread:$0]  %s749_s26, 4224, %s751_s29, [#allocation4], %s854_s24, %s854_s24, %s855_s25  }
 0x1b7   :  { %848 = dma.done.wait [#allocation4], 4224  }
 0x1b8   :  { %849 = vsyncadd [#allocation4], 4294963072 }
 0x1b9   :  { %761 = vsyncpa [#allocation3], 1 }
 0x1ba   :  { %762 = vsyncpa [#allocation6], 1 }
 0x1bb   :  { %763 = vsyncpa [#allocation4], 1 }

</bundles_post_ra>
